<compile_context>
chip_gen: v5e
topology: v5e:2x2
jax: 0.10.0
libtpu: 0.0.40
codegen_flags: <defaults>
</compile_context>

<pallas_src>
import math
import functools

import jax
import jax.numpy as jnp
from jax.experimental import pallas as pl
from jax.experimental.pallas import tpu as pltpu


def _make_kernel(nhead: int, eps: float):
    def kernel(x_ref,
               wqkv_ref, bqkv_ref,
               wo_ref, bo_ref,
               g1_ref, be1_ref,
               w1_ref, b1_ref, w2_ref, b2_ref,
               g2_ref, be2_ref,
               o_ref):
        N, S, E = x_ref.shape
        dh = E // nhead
        scale = 1.0 / math.sqrt(dh)

        x = x_ref[...]                        # (N, S, E) f32
        x2 = x.reshape(N * S, E)              # rows = (batch, seq) flattened (major merge, free)

        # ---- fused Q/K/V projection: one wide bf16 MXU matmul ----
        qkv = jnp.dot(x2.astype(jnp.bfloat16), wqkv_ref[...],
                      preferred_element_type=jnp.float32) + bqkv_ref[...]   # (N*S, 3E) f32
        qkv3 = qkv.reshape(N, S, 3 * E)       # major split, free

        # ---- multi-head scaled dot-product attention, batched over N ----
        head_outs = []
        for h in range(nhead):                # small static unroll (H is tiny here)
            lo = h * dh
            qh = (qkv3[:, :, lo:lo + dh] * scale).astype(jnp.bfloat16)       # (N, S, dh)
            kh = qkv3[:, :, E + lo:E + lo + dh].astype(jnp.bfloat16)
            vh = qkv3[:, :, 2 * E + lo:2 * E + lo + dh].astype(jnp.bfloat16)

            s = jnp.einsum('nqd,nkd->nqk', qh, kh,
                           preferred_element_type=jnp.float32)               # (N, S, S) f32
            s = s - jnp.max(s, axis=-1, keepdims=True)
            p = jnp.exp(s)
            p = p * pl.reciprocal(jnp.sum(p, axis=-1, keepdims=True), approx=True)
            head_outs.append(jnp.einsum('nqk,nkd->nqd', p.astype(jnp.bfloat16), vh,
                                        preferred_element_type=jnp.float32))  # (N, S, dh)
        attn = jnp.concatenate(head_outs, axis=-1).reshape(N * S, E)          # (N*S, E)

        # ---- output projection (bf16 MXU, f32 accumulate) ----
        attn = jnp.dot(attn.astype(jnp.bfloat16), wo_ref[...],
                       preferred_element_type=jnp.float32) + bo_ref[...]

        # ---- residual + LayerNorm1 (f32) ----
        h1 = x2 + attn
        m1 = jnp.mean(h1, axis=-1, keepdims=True)
        v1 = jnp.mean((h1 - m1) ** 2, axis=-1, keepdims=True)
        y = (h1 - m1) * jax.lax.rsqrt(v1 + eps) * g1_ref[...] + be1_ref[...]

        # ---- feed-forward: ReLU(linear1) -> linear2 ----
        f = jnp.dot(y.astype(jnp.bfloat16), w1_ref[...],
                    preferred_element_type=jnp.float32) + b1_ref[...]
        f = jnp.maximum(f, 0.0)
        f = jnp.dot(f.astype(jnp.bfloat16), w2_ref[...],
                    preferred_element_type=jnp.float32) + b2_ref[...]

        # ---- residual + LayerNorm2 (f32) ----
        h2 = y + f
        m2 = jnp.mean(h2, axis=-1, keepdims=True)
        v2 = jnp.mean((h2 - m2) ** 2, axis=-1, keepdims=True)
        out = (h2 - m2) * jax.lax.rsqrt(v2 + eps) * g2_ref[...] + be2_ref[...]

        o_ref[...] = out.reshape(N, S, E)

    return kernel


def self_attention_layer(x_sne, params, *, nhead: int, eps: float = 1e-5):
    """x_sne: (S, N, E) float32 (PyTorch batch_first=False layout)."""
    S, N, E = x_sne.shape
    assert E % nhead == 0, "d_model must be divisible by nhead"

    # TODO(synk): callers that already hold (batch, seq, feature) data can feed the
    # kernel directly and skip these two transposes (full HBM round trips at scale).
    x_nse = jnp.transpose(x_sne, (1, 0, 2))          # (N, S, E)

    # Pack Q/K/V weights & biases into one wide projection (bf16 weights for MXU).
    wqkv = jnp.concatenate([params["wq"], params["wk"], params["wv"]],
                           axis=1).astype(jnp.bfloat16)           # (E, 3E)
    bqkv = jnp.concatenate([params["bq"], params["bk"], params["bv"]], axis=1)  # (1, 3E)

    args = (
        x_nse, wqkv, bqkv,
        params["wo"].astype(jnp.bfloat16), params["bo"],
        params["g1"], params["be1"],
        params["w1"].astype(jnp.bfloat16), params["b1"],
        params["w2"].astype(jnp.bfloat16), params["b2"],
        params["g2"], params["be2"],
    )

    # Grid-free call: whole problem resident in VMEM, no pipelining / double
    # buffering, no per-grid-step overhead.  (For realistic S/E, tile the
    # sequence and stream K/V instead — see comments at top.)
    vmem_spec = pl.BlockSpec(memory_space=pltpu.MemorySpace.VMEM)
    out_nse = pl.pallas_call(
        _make_kernel(nhead, eps),
        out_shape=jax.ShapeDtypeStruct((N, S, E), jnp.float32),
        in_specs=[vmem_spec] * len(args),
        out_specs=vmem_spec,
        compiler_params=pltpu.CompilerParams(vmem_limit_bytes=32 * 1024 * 1024),
    )(*args)

    return jnp.transpose(out_nse, (1, 0, 2))          # back to (S, N, E)


def init_params(key, d_model, d_out, nhead, dim_feedforward):
    assert d_out == d_model, "residual x + ff_block(x) requires d_out == d_model"
    ks = jax.random.split(key, 8)
    std = 0.1

    def rnd(k, shape):
        return jax.random.normal(k, shape, jnp.float32) * std

    # nn.MultiheadAttention: in_proj (3E, E), out_proj (E, E).
    # Stored pre-transposed to (in, out) so the kernel does x @ W.
    wq = rnd(ks[0], (d_model, d_model))
    wk = rnd(ks[1], (d_model, d_model))
    wv = rnd(ks[2], (d_model, d_model))
    wo = rnd(ks[3], (d_model, d_model))
    w1 = rnd(ks[4], (d_model, dim_feedforward))      # linear1 (Relu layer)
    w2 = rnd(ks[5], (dim_feedforward, d_out))        # linear2
    bq = rnd(ks[6], (1, d_model))
    bk = jnp.zeros((1, d_model), jnp.float32)
    bv = rnd(ks[7], (1, d_model))
    bo = jnp.zeros((1, d_model), jnp.float32)
    b1 = jnp.zeros((1, dim_feedforward), jnp.float32)
    b2 = jnp.zeros((1, d_out), jnp.float32)
    # LayerNorm defaults: weight=1, bias=0
    g1 = jnp.ones((1, d_model), jnp.float32)
    be1 = jnp.zeros((1, d_model), jnp.float32)
    g2 = jnp.ones((1, d_out), jnp.float32)
    be2 = jnp.zeros((1, d_out), jnp.float32)

    return dict(wq=wq, wk=wk, wv=wv, bq=bq, bk=bk, bv=bv, wo=wo, bo=bo,
                g1=g1, be1=be1, w1=w1, b1=b1, w2=w2, b2=b2, g2=g2, be2=be2)


if __name__ == "__main__":
    # Small shapes: seq=8, batch=2, d_model=d_out=32, nhead=4, dim_feedforward=64
    S, N, E, H, DFF = 8, 2, 32, 4, 64

    key = jax.random.PRNGKey(0)
    k_x, k_p = jax.random.split(key)
    x = jax.random.normal(k_x, (S, N, E), jnp.float32)   # (seq, batch, feature)
    params = init_params(k_p, d_model=E, d_out=E, nhead=H, dim_feedforward=DFF)

    fn = jax.jit(functools.partial(self_attention_layer, nhead=H))
    out = fn(x, params)
    jax.block_until_ready(out)
    assert out.shape == (S, N, E) and out.dtype == jnp.float32
    assert bool(jnp.all(jnp.isfinite(out)))
    print("KERNEL_OK")
</pallas_src>

<mosaic_0001>
module attributes {stable_mosaic.version = 11 : i64} {
  func.func @kernel(%arg0: memref<2x8x32xf32, #tpu.memory_space<vmem>>, %arg1: memref<32x96xbf16, #tpu.memory_space<vmem>>, %arg2: memref<1x96xf32, #tpu.memory_space<vmem>>, %arg3: memref<32x32xbf16, #tpu.memory_space<vmem>>, %arg4: memref<1x32xf32, #tpu.memory_space<vmem>>, %arg5: memref<1x32xf32, #tpu.memory_space<vmem>>, %arg6: memref<1x32xf32, #tpu.memory_space<vmem>>, %arg7: memref<32x64xbf16, #tpu.memory_space<vmem>>, %arg8: memref<1x64xf32, #tpu.memory_space<vmem>>, %arg9: memref<64x32xbf16, #tpu.memory_space<vmem>>, %arg10: memref<1x32xf32, #tpu.memory_space<vmem>>, %arg11: memref<1x32xf32, #tpu.memory_space<vmem>>, %arg12: memref<1x32xf32, #tpu.memory_space<vmem>>, %arg13: memref<2x8x32xf32, #tpu.memory_space<vmem>>) attributes {dimension_semantics = [], scalar_prefetch = 0 : i64, scratch_operands = 0 : i64, tpu.core_type = #tpu.core_type<tc>} {
    %c0 = arith.constant 0 : index
    %c0_0 = arith.constant 0 : index
    %c0_1 = arith.constant 0 : index
    %0 = vector.load %arg0[%c0, %c0_0, %c0_1] : memref<2x8x32xf32, #tpu.memory_space<vmem>>, vector<2x8x32xf32>
    %1 = vector.shape_cast %0 : vector<2x8x32xf32> to vector<16x32xf32>
    %2 = arith.truncf %1 : vector<16x32xf32> to vector<16x32xbf16>
    %c0_2 = arith.constant 0 : index
    %c0_3 = arith.constant 0 : index
    %3 = vector.load %arg1[%c0_2, %c0_3] : memref<32x96xbf16, #tpu.memory_space<vmem>>, vector<32x96xbf16>
    %cst = arith.constant dense<0.000000e+00> : vector<16x96xf32>
    %4 = tpu.matmul %2, %3, %cst {dimension_numbers = #tpu.dot_dimension_numbers<[1], [0], [0], [1], [0, 0, 1, 1], [], []>} : vector<16x32xbf16>, vector<32x96xbf16>, vector<16x96xf32> -> vector<16x96xf32>
    %c0_4 = arith.constant 0 : index
    %c0_5 = arith.constant 0 : index
    %5 = vector.load %arg2[%c0_4, %c0_5] : memref<1x96xf32, #tpu.memory_space<vmem>>, vector<1x96xf32>
    %6 = vector.broadcast %5 : vector<1x96xf32> to vector<16x96xf32>
    %7 = arith.addf %4, %6 : vector<16x96xf32>
    %8 = vector.shape_cast %7 : vector<16x96xf32> to vector<2x8x96xf32>
    %9 = vector.extract_strided_slice %8 {offsets = [0, 0, 0], sizes = [2, 8, 8], strides = [1, 1, 1]} : vector<2x8x96xf32> to vector<2x8x8xf32>
    %cst_6 = arith.constant 0.353553385 : f32
    %10 = vector.broadcast %cst_6 : f32 to vector<2x8x8xf32>
    %11 = arith.mulf %9, %10 : vector<2x8x8xf32>
    %12 = arith.truncf %11 : vector<2x8x8xf32> to vector<2x8x8xbf16>
    %13 = vector.extract_strided_slice %8 {offsets = [0, 0, 32], sizes = [2, 8, 8], strides = [1, 1, 1]} : vector<2x8x96xf32> to vector<2x8x8xf32>
    %14 = arith.truncf %13 : vector<2x8x8xf32> to vector<2x8x8xbf16>
    %15 = vector.extract_strided_slice %8 {offsets = [0, 0, 64], sizes = [2, 8, 8], strides = [1, 1, 1]} : vector<2x8x96xf32> to vector<2x8x8xf32>
    %16 = arith.truncf %15 : vector<2x8x8xf32> to vector<2x8x8xbf16>
    "tpu.trace_start"() <{level = 10 : i32, message = "nqd,nkd->nqk"}> : () -> ()
    %cst_7 = arith.constant dense<0.000000e+00> : vector<2x8x8xf32>
    %17 = tpu.matmul %12, %14, %cst_7 {dimension_numbers = #tpu.dot_dimension_numbers<[2], [2], [1], [1], [0, 0, 0, 1, 1, 1], [0], [0]>} : vector<2x8x8xbf16>, vector<2x8x8xbf16>, vector<2x8x8xf32> -> vector<2x8x8xf32>
    "tpu.trace_stop"() : () -> ()
    %cst_8 = arith.constant dense<0xFF800000> : vector<2x8xf32>
    %18 = vector.multi_reduction <maximumf>, %17, %cst_8 [2] : vector<2x8x8xf32> to vector<2x8xf32>
    %19 = vector.shape_cast %18 : vector<2x8xf32> to vector<2x8x1xf32>
    %20 = vector.broadcast %19 : vector<2x8x1xf32> to vector<2x8x8xf32>
    %21 = arith.subf %17, %20 : vector<2x8x8xf32>
    %22 = math.exp %21 : vector<2x8x8xf32>
    %cst_9 = arith.constant dense<0.000000e+00> : vector<2x8xf32>
    %23 = vector.multi_reduction <add>, %22, %cst_9 [2] : vector<2x8x8xf32> to vector<2x8xf32>
    %24 = vector.shape_cast %23 : vector<2x8xf32> to vector<2x8x1xf32>
    %25 = tpu.reciprocal %24 {approx = true} : vector<2x8x1xf32> -> vector<2x8x1xf32>
    %26 = vector.broadcast %25 : vector<2x8x1xf32> to vector<2x8x8xf32>
    %27 = arith.mulf %22, %26 : vector<2x8x8xf32>
    %28 = arith.truncf %27 : vector<2x8x8xf32> to vector<2x8x8xbf16>
    "tpu.trace_start"() <{level = 10 : i32, message = "nqk,nkd->nqd"}> : () -> ()
    %cst_10 = arith.constant dense<0.000000e+00> : vector<2x8x8xf32>
    %29 = tpu.matmul %28, %16, %cst_10 {dimension_numbers = #tpu.dot_dimension_numbers<[2], [1], [1], [2], [0, 0, 0, 1, 1, 2], [0], [0]>} : vector<2x8x8xbf16>, vector<2x8x8xbf16>, vector<2x8x8xf32> -> vector<2x8x8xf32>
    "tpu.trace_stop"() : () -> ()
    %30 = vector.extract_strided_slice %8 {offsets = [0, 0, 8], sizes = [2, 8, 8], strides = [1, 1, 1]} : vector<2x8x96xf32> to vector<2x8x8xf32>
    %cst_11 = arith.constant 0.353553385 : f32
    %31 = vector.broadcast %cst_11 : f32 to vector<2x8x8xf32>
    %32 = arith.mulf %30, %31 : vector<2x8x8xf32>
    %33 = arith.truncf %32 : vector<2x8x8xf32> to vector<2x8x8xbf16>
    %34 = vector.extract_strided_slice %8 {offsets = [0, 0, 40], sizes = [2, 8, 8], strides = [1, 1, 1]} : vector<2x8x96xf32> to vector<2x8x8xf32>
    %35 = arith.truncf %34 : vector<2x8x8xf32> to vector<2x8x8xbf16>
    %36 = vector.extract_strided_slice %8 {offsets = [0, 0, 72], sizes = [2, 8, 8], strides = [1, 1, 1]} : vector<2x8x96xf32> to vector<2x8x8xf32>
    %37 = arith.truncf %36 : vector<2x8x8xf32> to vector<2x8x8xbf16>
    "tpu.trace_start"() <{level = 10 : i32, message = "nqd,nkd->nqk"}> : () -> ()
    %cst_12 = arith.constant dense<0.000000e+00> : vector<2x8x8xf32>
    %38 = tpu.matmul %33, %35, %cst_12 {dimension_numbers = #tpu.dot_dimension_numbers<[2], [2], [1], [1], [0, 0, 0, 1, 1, 1], [0], [0]>} : vector<2x8x8xbf16>, vector<2x8x8xbf16>, vector<2x8x8xf32> -> vector<2x8x8xf32>
    "tpu.trace_stop"() : () -> ()
    %cst_13 = arith.constant dense<0xFF800000> : vector<2x8xf32>
    %39 = vector.multi_reduction <maximumf>, %38, %cst_13 [2] : vector<2x8x8xf32> to vector<2x8xf32>
    %40 = vector.shape_cast %39 : vector<2x8xf32> to vector<2x8x1xf32>
    %41 = vector.broadcast %40 : vector<2x8x1xf32> to vector<2x8x8xf32>
    %42 = arith.subf %38, %41 : vector<2x8x8xf32>
    %43 = math.exp %42 : vector<2x8x8xf32>
    %cst_14 = arith.constant dense<0.000000e+00> : vector<2x8xf32>
    %44 = vector.multi_reduction <add>, %43, %cst_14 [2] : vector<2x8x8xf32> to vector<2x8xf32>
    %45 = vector.shape_cast %44 : vector<2x8xf32> to vector<2x8x1xf32>
    %46 = tpu.reciprocal %45 {approx = true} : vector<2x8x1xf32> -> vector<2x8x1xf32>
    %47 = vector.broadcast %46 : vector<2x8x1xf32> to vector<2x8x8xf32>
    %48 = arith.mulf %43, %47 : vector<2x8x8xf32>
    %49 = arith.truncf %48 : vector<2x8x8xf32> to vector<2x8x8xbf16>
    "tpu.trace_start"() <{level = 10 : i32, message = "nqk,nkd->nqd"}> : () -> ()
    %cst_15 = arith.constant dense<0.000000e+00> : vector<2x8x8xf32>
    %50 = tpu.matmul %49, %37, %cst_15 {dimension_numbers = #tpu.dot_dimension_numbers<[2], [1], [1], [2], [0, 0, 0, 1, 1, 2], [0], [0]>} : vector<2x8x8xbf16>, vector<2x8x8xbf16>, vector<2x8x8xf32> -> vector<2x8x8xf32>
    "tpu.trace_stop"() : () -> ()
    %51 = vector.extract_strided_slice %8 {offsets = [0, 0, 16], sizes = [2, 8, 8], strides = [1, 1, 1]} : vector<2x8x96xf32> to vector<2x8x8xf32>
    %cst_16 = arith.constant 0.353553385 : f32
    %52 = vector.broadcast %cst_16 : f32 to vector<2x8x8xf32>
    %53 = arith.mulf %51, %52 : vector<2x8x8xf32>
    %54 = arith.truncf %53 : vector<2x8x8xf32> to vector<2x8x8xbf16>
    %55 = vector.extract_strided_slice %8 {offsets = [0, 0, 48], sizes = [2, 8, 8], strides = [1, 1, 1]} : vector<2x8x96xf32> to vector<2x8x8xf32>
    %56 = arith.truncf %55 : vector<2x8x8xf32> to vector<2x8x8xbf16>
    %57 = vector.extract_strided_slice %8 {offsets = [0, 0, 80], sizes = [2, 8, 8], strides = [1, 1, 1]} : vector<2x8x96xf32> to vector<2x8x8xf32>
    %58 = arith.truncf %57 : vector<2x8x8xf32> to vector<2x8x8xbf16>
    "tpu.trace_start"() <{level = 10 : i32, message = "nqd,nkd->nqk"}> : () -> ()
    %cst_17 = arith.constant dense<0.000000e+00> : vector<2x8x8xf32>
    %59 = tpu.matmul %54, %56, %cst_17 {dimension_numbers = #tpu.dot_dimension_numbers<[2], [2], [1], [1], [0, 0, 0, 1, 1, 1], [0], [0]>} : vector<2x8x8xbf16>, vector<2x8x8xbf16>, vector<2x8x8xf32> -> vector<2x8x8xf32>
    "tpu.trace_stop"() : () -> ()
    %cst_18 = arith.constant dense<0xFF800000> : vector<2x8xf32>
    %60 = vector.multi_reduction <maximumf>, %59, %cst_18 [2] : vector<2x8x8xf32> to vector<2x8xf32>
    %61 = vector.shape_cast %60 : vector<2x8xf32> to vector<2x8x1xf32>
    %62 = vector.broadcast %61 : vector<2x8x1xf32> to vector<2x8x8xf32>
    %63 = arith.subf %59, %62 : vector<2x8x8xf32>
    %64 = math.exp %63 : vector<2x8x8xf32>
    %cst_19 = arith.constant dense<0.000000e+00> : vector<2x8xf32>
    %65 = vector.multi_reduction <add>, %64, %cst_19 [2] : vector<2x8x8xf32> to vector<2x8xf32>
    %66 = vector.shape_cast %65 : vector<2x8xf32> to vector<2x8x1xf32>
    %67 = tpu.reciprocal %66 {approx = true} : vector<2x8x1xf32> -> vector<2x8x1xf32>
    %68 = vector.broadcast %67 : vector<2x8x1xf32> to vector<2x8x8xf32>
    %69 = arith.mulf %64, %68 : vector<2x8x8xf32>
    %70 = arith.truncf %69 : vector<2x8x8xf32> to vector<2x8x8xbf16>
    "tpu.trace_start"() <{level = 10 : i32, message = "nqk,nkd->nqd"}> : () -> ()
    %cst_20 = arith.constant dense<0.000000e+00> : vector<2x8x8xf32>
    %71 = tpu.matmul %70, %58, %cst_20 {dimension_numbers = #tpu.dot_dimension_numbers<[2], [1], [1], [2], [0, 0, 0, 1, 1, 2], [0], [0]>} : vector<2x8x8xbf16>, vector<2x8x8xbf16>, vector<2x8x8xf32> -> vector<2x8x8xf32>
    "tpu.trace_stop"() : () -> ()
    %72 = vector.extract_strided_slice %8 {offsets = [0, 0, 24], sizes = [2, 8, 8], strides = [1, 1, 1]} : vector<2x8x96xf32> to vector<2x8x8xf32>
    %cst_21 = arith.constant 0.353553385 : f32
    %73 = vector.broadcast %cst_21 : f32 to vector<2x8x8xf32>
    %74 = arith.mulf %72, %73 : vector<2x8x8xf32>
    %75 = arith.truncf %74 : vector<2x8x8xf32> to vector<2x8x8xbf16>
    %76 = vector.extract_strided_slice %8 {offsets = [0, 0, 56], sizes = [2, 8, 8], strides = [1, 1, 1]} : vector<2x8x96xf32> to vector<2x8x8xf32>
    %77 = arith.truncf %76 : vector<2x8x8xf32> to vector<2x8x8xbf16>
    %78 = vector.extract_strided_slice %8 {offsets = [0, 0, 88], sizes = [2, 8, 8], strides = [1, 1, 1]} : vector<2x8x96xf32> to vector<2x8x8xf32>
    %79 = arith.truncf %78 : vector<2x8x8xf32> to vector<2x8x8xbf16>
    "tpu.trace_start"() <{level = 10 : i32, message = "nqd,nkd->nqk"}> : () -> ()
    %cst_22 = arith.constant dense<0.000000e+00> : vector<2x8x8xf32>
    %80 = tpu.matmul %75, %77, %cst_22 {dimension_numbers = #tpu.dot_dimension_numbers<[2], [2], [1], [1], [0, 0, 0, 1, 1, 1], [0], [0]>} : vector<2x8x8xbf16>, vector<2x8x8xbf16>, vector<2x8x8xf32> -> vector<2x8x8xf32>
    "tpu.trace_stop"() : () -> ()
    %cst_23 = arith.constant dense<0xFF800000> : vector<2x8xf32>
    %81 = vector.multi_reduction <maximumf>, %80, %cst_23 [2] : vector<2x8x8xf32> to vector<2x8xf32>
    %82 = vector.shape_cast %81 : vector<2x8xf32> to vector<2x8x1xf32>
    %83 = vector.broadcast %82 : vector<2x8x1xf32> to vector<2x8x8xf32>
    %84 = arith.subf %80, %83 : vector<2x8x8xf32>
    %85 = math.exp %84 : vector<2x8x8xf32>
    %cst_24 = arith.constant dense<0.000000e+00> : vector<2x8xf32>
    %86 = vector.multi_reduction <add>, %85, %cst_24 [2] : vector<2x8x8xf32> to vector<2x8xf32>
    %87 = vector.shape_cast %86 : vector<2x8xf32> to vector<2x8x1xf32>
    %88 = tpu.reciprocal %87 {approx = true} : vector<2x8x1xf32> -> vector<2x8x1xf32>
    %89 = vector.broadcast %88 : vector<2x8x1xf32> to vector<2x8x8xf32>
    %90 = arith.mulf %85, %89 : vector<2x8x8xf32>
    %91 = arith.truncf %90 : vector<2x8x8xf32> to vector<2x8x8xbf16>
    "tpu.trace_start"() <{level = 10 : i32, message = "nqk,nkd->nqd"}> : () -> ()
    %cst_25 = arith.constant dense<0.000000e+00> : vector<2x8x8xf32>
    %92 = tpu.matmul %91, %79, %cst_25 {dimension_numbers = #tpu.dot_dimension_numbers<[2], [1], [1], [2], [0, 0, 0, 1, 1, 2], [0], [0]>} : vector<2x8x8xbf16>, vector<2x8x8xbf16>, vector<2x8x8xf32> -> vector<2x8x8xf32>
    "tpu.trace_stop"() : () -> ()
    %93 = tpu.concatenate %29, %50, %71, %92 in 2 : vector<2x8x8xf32>, vector<2x8x8xf32>, vector<2x8x8xf32>, vector<2x8x8xf32> -> vector<2x8x32xf32>
    %94 = vector.shape_cast %93 : vector<2x8x32xf32> to vector<16x32xf32>
    %95 = arith.truncf %94 : vector<16x32xf32> to vector<16x32xbf16>
    %c0_26 = arith.constant 0 : index
    %c0_27 = arith.constant 0 : index
    %96 = vector.load %arg3[%c0_26, %c0_27] : memref<32x32xbf16, #tpu.memory_space<vmem>>, vector<32x32xbf16>
    %cst_28 = arith.constant dense<0.000000e+00> : vector<16x32xf32>
    %97 = tpu.matmul %95, %96, %cst_28 {dimension_numbers = #tpu.dot_dimension_numbers<[1], [0], [0], [1], [0, 0, 1, 1], [], []>} : vector<16x32xbf16>, vector<32x32xbf16>, vector<16x32xf32> -> vector<16x32xf32>
    %c0_29 = arith.constant 0 : index
    %c0_30 = arith.constant 0 : index
    %98 = vector.load %arg4[%c0_29, %c0_30] : memref<1x32xf32, #tpu.memory_space<vmem>>, vector<1x32xf32>
    %99 = vector.broadcast %98 : vector<1x32xf32> to vector<16x32xf32>
    %100 = arith.addf %97, %99 : vector<16x32xf32>
    %101 = arith.addf %1, %100 : vector<16x32xf32>
    %cst_31 = arith.constant dense<0.000000e+00> : vector<16xf32>
    %102 = vector.multi_reduction <add>, %101, %cst_31 [1] : vector<16x32xf32> to vector<16xf32>
    %103 = vector.shape_cast %102 : vector<16xf32> to vector<16x1xf32>
    %cst_32 = arith.constant 3.200000e+01 : f32
    %104 = vector.broadcast %cst_32 : f32 to vector<16x1xf32>
    %105 = arith.divf %103, %104 : vector<16x1xf32>
    %106 = vector.broadcast %105 : vector<16x1xf32> to vector<16x32xf32>
    %107 = arith.subf %101, %106 : vector<16x32xf32>
    %108 = arith.mulf %107, %107 : vector<16x32xf32>
    %cst_33 = arith.constant dense<0.000000e+00> : vector<16xf32>
    %109 = vector.multi_reduction <add>, %108, %cst_33 [1] : vector<16x32xf32> to vector<16xf32>
    %110 = vector.shape_cast %109 : vector<16xf32> to vector<16x1xf32>
    %cst_34 = arith.constant 3.200000e+01 : f32
    %111 = vector.broadcast %cst_34 : f32 to vector<16x1xf32>
    %112 = arith.divf %110, %111 : vector<16x1xf32>
    %113 = vector.broadcast %105 : vector<16x1xf32> to vector<16x32xf32>
    %114 = arith.subf %101, %113 : vector<16x32xf32>
    %cst_35 = arith.constant 9.99999974E-6 : f32
    %115 = vector.broadcast %cst_35 : f32 to vector<16x1xf32>
    %116 = arith.addf %112, %115 : vector<16x1xf32>
    %117 = math.rsqrt %116 : vector<16x1xf32>
    %118 = vector.broadcast %117 : vector<16x1xf32> to vector<16x32xf32>
    %119 = arith.mulf %114, %118 : vector<16x32xf32>
    %c0_36 = arith.constant 0 : index
    %c0_37 = arith.constant 0 : index
    %120 = vector.load %arg5[%c0_36, %c0_37] : memref<1x32xf32, #tpu.memory_space<vmem>>, vector<1x32xf32>
    %121 = vector.broadcast %120 : vector<1x32xf32> to vector<16x32xf32>
    %122 = arith.mulf %119, %121 : vector<16x32xf32>
    %c0_38 = arith.constant 0 : index
    %c0_39 = arith.constant 0 : index
    %123 = vector.load %arg6[%c0_38, %c0_39] : memref<1x32xf32, #tpu.memory_space<vmem>>, vector<1x32xf32>
    %124 = vector.broadcast %123 : vector<1x32xf32> to vector<16x32xf32>
    %125 = arith.addf %122, %124 : vector<16x32xf32>
    %126 = arith.truncf %125 : vector<16x32xf32> to vector<16x32xbf16>
    %c0_40 = arith.constant 0 : index
    %c0_41 = arith.constant 0 : index
    %127 = vector.load %arg7[%c0_40, %c0_41] : memref<32x64xbf16, #tpu.memory_space<vmem>>, vector<32x64xbf16>
    %cst_42 = arith.constant dense<0.000000e+00> : vector<16x64xf32>
    %128 = tpu.matmul %126, %127, %cst_42 {dimension_numbers = #tpu.dot_dimension_numbers<[1], [0], [0], [1], [0, 0, 1, 1], [], []>} : vector<16x32xbf16>, vector<32x64xbf16>, vector<16x64xf32> -> vector<16x64xf32>
    %c0_43 = arith.constant 0 : index
    %c0_44 = arith.constant 0 : index
    %129 = vector.load %arg8[%c0_43, %c0_44] : memref<1x64xf32, #tpu.memory_space<vmem>>, vector<1x64xf32>
    %130 = vector.broadcast %129 : vector<1x64xf32> to vector<16x64xf32>
    %131 = arith.addf %128, %130 : vector<16x64xf32>
    %cst_45 = arith.constant 0.000000e+00 : f32
    %132 = vector.broadcast %cst_45 : f32 to vector<16x64xf32>
    %133 = arith.maximumf %131, %132 : vector<16x64xf32>
    %134 = arith.truncf %133 : vector<16x64xf32> to vector<16x64xbf16>
    %c0_46 = arith.constant 0 : index
    %c0_47 = arith.constant 0 : index
    %135 = vector.load %arg9[%c0_46, %c0_47] : memref<64x32xbf16, #tpu.memory_space<vmem>>, vector<64x32xbf16>
    %cst_48 = arith.constant dense<0.000000e+00> : vector<16x32xf32>
    %136 = tpu.matmul %134, %135, %cst_48 {dimension_numbers = #tpu.dot_dimension_numbers<[1], [0], [0], [1], [0, 0, 1, 1], [], []>} : vector<16x64xbf16>, vector<64x32xbf16>, vector<16x32xf32> -> vector<16x32xf32>
    %c0_49 = arith.constant 0 : index
    %c0_50 = arith.constant 0 : index
    %137 = vector.load %arg10[%c0_49, %c0_50] : memref<1x32xf32, #tpu.memory_space<vmem>>, vector<1x32xf32>
    %138 = vector.broadcast %137 : vector<1x32xf32> to vector<16x32xf32>
    %139 = arith.addf %136, %138 : vector<16x32xf32>
    %140 = arith.addf %125, %139 : vector<16x32xf32>
    %cst_51 = arith.constant dense<0.000000e+00> : vector<16xf32>
    %141 = vector.multi_reduction <add>, %140, %cst_51 [1] : vector<16x32xf32> to vector<16xf32>
    %142 = vector.shape_cast %141 : vector<16xf32> to vector<16x1xf32>
    %cst_52 = arith.constant 3.200000e+01 : f32
    %143 = vector.broadcast %cst_52 : f32 to vector<16x1xf32>
    %144 = arith.divf %142, %143 : vector<16x1xf32>
    %145 = vector.broadcast %144 : vector<16x1xf32> to vector<16x32xf32>
    %146 = arith.subf %140, %145 : vector<16x32xf32>
    %147 = arith.mulf %146, %146 : vector<16x32xf32>
    %cst_53 = arith.constant dense<0.000000e+00> : vector<16xf32>
    %148 = vector.multi_reduction <add>, %147, %cst_53 [1] : vector<16x32xf32> to vector<16xf32>
    %149 = vector.shape_cast %148 : vector<16xf32> to vector<16x1xf32>
    %cst_54 = arith.constant 3.200000e+01 : f32
    %150 = vector.broadcast %cst_54 : f32 to vector<16x1xf32>
    %151 = arith.divf %149, %150 : vector<16x1xf32>
    %152 = vector.broadcast %144 : vector<16x1xf32> to vector<16x32xf32>
    %153 = arith.subf %140, %152 : vector<16x32xf32>
    %cst_55 = arith.constant 9.99999974E-6 : f32
    %154 = vector.broadcast %cst_55 : f32 to vector<16x1xf32>
    %155 = arith.addf %151, %154 : vector<16x1xf32>
    %156 = math.rsqrt %155 : vector<16x1xf32>
    %157 = vector.broadcast %156 : vector<16x1xf32> to vector<16x32xf32>
    %158 = arith.mulf %153, %157 : vector<16x32xf32>
    %c0_56 = arith.constant 0 : index
    %c0_57 = arith.constant 0 : index
    %159 = vector.load %arg11[%c0_56, %c0_57] : memref<1x32xf32, #tpu.memory_space<vmem>>, vector<1x32xf32>
    %160 = vector.broadcast %159 : vector<1x32xf32> to vector<16x32xf32>
    %161 = arith.mulf %158, %160 : vector<16x32xf32>
    %c0_58 = arith.constant 0 : index
    %c0_59 = arith.constant 0 : index
    %162 = vector.load %arg12[%c0_58, %c0_59] : memref<1x32xf32, #tpu.memory_space<vmem>>, vector<1x32xf32>
    %163 = vector.broadcast %162 : vector<1x32xf32> to vector<16x32xf32>
    %164 = arith.addf %161, %163 : vector<16x32xf32>
    %165 = vector.shape_cast %164 : vector<16x32xf32> to vector<2x8x32xf32>
    %c0_60 = arith.constant 0 : index
    %c0_61 = arith.constant 0 : index
    %c0_62 = arith.constant 0 : index
    %166 = vector.load %arg13[%c0_60, %c0_61, %c0_62] : memref<2x8x32xf32, #tpu.memory_space<vmem>>, vector<2x8x32xf32>
    tpu.vector_store %arg13[%c0_60, %c0_61, %c0_62], %165 {strides = array<i32>} : memref<2x8x32xf32, #tpu.memory_space<vmem>>, vector<2x8x32xf32>,
    return
  }
}

</mosaic_0001>

<bundles_post_ra>
// kernel: self_attention_layer.1
= control target key start
LH: loop header
LB: loop body
LE: loop exit
PB: predicated region body
PF: predicated region fallthrough
CT: control target
= control target key end

     0   :  { %vm68_vm0 = vcmask 261120   ;;  %s997_s18 = smov 80   ;;  %s998_s19 = smov 112   ;;  %vm97_vm1 = vcmask 64512   ;;  %vm170_vm2 = vcmask 1043456   ;;  %vm576_vm3 = vcmask 130048   ;;  %s1278_s1 = inlined_call_operand.vmem [shape: bf16[32,96], index: 1, kind: input, shape index: {}]   ;;  %s1279_s0 = inlined_call_operand.vmem [shape: f32[2,8,32], index: 0, kind: input, shape index: {}]   ;;  %s1280_s2 = inlined_call_operand.vmem [shape: f32[1,96], index: 2, kind: input, shape index: {}]   ;;  %s1281_s4 = inlined_call_operand.vmem [shape: f32[1,32], index: 4, kind: input, shape index: {}]   ;;  %s1282_s3 = inlined_call_operand.vmem [shape: bf16[32,32], index: 3, kind: input, shape index: {}]   ;;  %s1283_s5 = inlined_call_operand.vmem [shape: f32[1,32], index: 5, kind: input, shape index: {}]   ;;  %s1284_s6 = inlined_call_operand.vmem [shape: f32[1,32], index: 6, kind: input, shape index: {}]   ;;  %s1285_s8 = inlined_call_operand.vmem [shape: f32[1,64], index: 8, kind: input, shape index: {}]   ;;  %s1286_s7 = inlined_call_operand.vmem [shape: bf16[32,64], index: 7, kind: input, shape index: {}]   ;;  %s1287_s10 = inlined_call_operand.vmem [shape: f32[1,32], index: 10, kind: input, shape index: {}]   ;;  %s1288_s9 = inlined_call_operand.vmem [shape: bf16[64,32], index: 9, kind: input, shape index: {}]   ;;  %s1289_s11 = inlined_call_operand.vmem [shape: f32[1,32], index: 11, kind: input, shape index: {}]   ;;  %s1290_s12 = inlined_call_operand.vmem [shape: f32[1,32], index: 12, kind: input, shape index: {}]   ;;  %s1291_s13 = inlined_call_operand.vmem [shape: f32[2,8,32], index: 13, kind: output, shape index: {}]  }
   0x1   :  { %v905_v0 = vld [vmem:[%s1278_s1 + $0x8] sm:$0xff]  ;;  %v904_v1 = vld [vmem:[%s1278_s1] sm:$0xff]  ;;  %s995_s1 = smov 96   ;;  %s999_s20 = smov 72   ;;  %vm579_vm4 = vcmask 195584   ;;  %vm762_vm12 = vcmask 523264  }
   0x2   :  { %78 = vmatpush.bf16.msra.mxu0 %v905_v0  ;;  %v1088_v2 = vld [vmem:[%s1279_s0] sm:$0xff]  ;;  %v1093_v3 = vld [vmem:[%s1279_s0 + $0x8] sm:$0xff]  ;;  %s994_s0 = smov 88   ;;  %s1000_s21 = smov 104  }
   0x3   :  { %v47_v4 = vpack.c.bf16 %v1093_v3, %v1088_v2  ;;  %v944_v5 = vld [vmem:[%s1280_s2] ss:$0 sm:$0xff]  ;;  %s996_s2 = smov 120   ;;  %s1001_s22 = smov 64  }
   0x4   :  { %s1002_s23 = smov 56   ;;  %s1003_s24 = smov 48  }
   0x5   :  { %s1004_s25 = smov 40   ;;  %s1005_s26 = smov 8  }
   0x6   :  { %79 = vmatpush.bf16.msra.mxu0 %v904_v1  ;;  %s1006_s27 = smov 16   ;;  %s1007_s28 = smov 24  }
   0x9   :  { %852 = vmatmul.msk.bf16.vlgmr.msra.gmra.mxu0 %vm68_vm0, %v47_v4 }
  0x86   :  { %v81_v6 = vpop.f32.mrf.mxu0 }
  0x87   :  { %v82_v7 = vadd.f32 %v944_v5, %v81_v6 }
  0x89   :  { %v86_v8 = vmul.f32 0.35355338, %v82_v7  ;;  %v90_v9 = vpack.c.bf16 %v82_v7, %v82_v7 }
  0x8b   :  { %v88_v10 = vpack.c.bf16 %v86_v8, %v86_v8  ;;  %v93_v11 = vunpack.c.l.b16 %v90_v9 }
  0x8d   :  { %v1101_v12 = vpack.c.b16 %v93_v11, %v93_v11  ;;  %v209_v13 = vunpack.c.l.b16 %v88_v10 }
  0x8e   :  { %v83_v14 = vpop.f32.mrf.mxu0 }
  0x8f   :  { %v84_v15 = vadd.f32 %v944_v5, %v83_v14  ;;  %213 = vrot.lane.b32.xlu1 %v1101_v12, %s994_s0  ;;  %95 = vrot.lane.b32.xlu0 %v1101_v12, %s995_s1  ;;  %v210_v16 = vpack.c.b16 %v209_v13, %v209_v13 }
  0x91   :  { %v87_v17 = vmul.f32 0.35355338, %v84_v15  ;;  %v91_v18 = vpack.c.bf16 %v84_v15, %v84_v15  ;;  %211 = vrot.lane.b32.xlu2 %v210_v16, %s996_s2 }
  0x93   :  { %v89_v19 = vpack.c.bf16 %v87_v17, %v87_v17  ;;  %v118_v20 = vunpack.c.l.b16 %v91_v18 }
  0x95   :  { %v1105_v21 = vpack.c.b16 %v118_v20, %v118_v20  ;;  %v235_v22 = vunpack.c.l.b16 %v89_v19 }
  0x97   :  { %239 = vrot.lane.b32.xlu1 %v1105_v21, %s994_s0  ;;  %120 = vrot.lane.b32.xlu0 %v1105_v21, %s995_s1  ;;  %v236_v23 = vpack.c.b16 %v235_v22, %v235_v22 }
  0x99   :  { %237 = vrot.lane.b32.xlu2 %v236_v23, %s996_s2 }
  0x9f   :  { %351 = vrot.lane.b32.xlu1 %v1105_v21, %s997_s18  ;;  %328 = vrot.lane.b32.xlu0 %v1101_v12, %s997_s18 }
  0xa1   :  { %326 = vrot.lane.b32.xlu2 %v210_v16, %s998_s19 }
  0xa7   :  { %440 = vrot.lane.b32.xlu1 %v1101_v12, %s999_s20  ;;  %349 = vrot.lane.b32.xlu0 %v236_v23, %s998_s19 }
  0xa9   :  { %463 = vrot.lane.b32.xlu2 %v1105_v21, %s999_s20 }
  0xaf   :  { %461 = vrot.lane.b32.xlu1 %v236_v23, %s1000_s21  ;;  %438 = vrot.lane.b32.xlu0 %v210_v16, %s1000_s21 }
  0xeb   :  { %v212_v24 = vpop.permute.xlu2 %211 }
  0xf3   :  { %v238_v29 = vpop.permute.xlu2 %237 }
  0xfb   :  { %v327_v34 = vpop.permute.xlu2 %326 }
 0x101   :  { %v214_v25 = vpop.permute.xlu1 %213  ;;  %v96_v26 = vpop.permute.xlu0 %95 }
 0x102   :  { %v102_v27 = vsel %vm97_vm1, %v96_v26, 0  ;;  %v219_v28 = vsel %vm97_vm1, %v214_v25, 0 }
 0x103   :  { %111 = vmatpush.bf16.xpose.msra.mxu1 %v102_v27  ;;  %228 = vmatpush.bf16.xpose.msrb.mxu0 %v219_v28  ;;  %v464_v39 = vpop.permute.xlu2 %463 }
 0x104   :  { %v469_v41 = vsel %vm97_vm1, %v464_v39, 0 }
 0x109   :  { %v240_v30 = vpop.permute.xlu1 %239  ;;  %v121_v31 = vpop.permute.xlu0 %120 }
 0x10a   :  { %853 = vmatmul.msk.bf16.vlgmr.msra.gmra.mxu1 %vm97_vm1, %v88_v10  ;;  %857 = vmatmul.msk.bf16.vlgmr.msrb.gmra.mxu0 %vm97_vm1, %v212_v24  ;;  %v126_v32 = vsel %vm97_vm1, %v121_v31, 0  ;;  %v245_v33 = vsel %vm97_vm1, %v240_v30, 0 }
 0x10b   :  { %135 = vmatpush.bf16.xpose.msra.mxu2 %v126_v32  ;;  %254 = vmatpush.bf16.xpose.msrb.mxu1 %v245_v33 }
 0x111   :  { %v352_v35 = vpop.permute.xlu1 %351  ;;  %v329_v36 = vpop.permute.xlu0 %328 }
 0x112   :  { %v357_v37 = vsel %vm97_vm1, %v352_v35, 0  ;;  %v334_v38 = vsel %vm97_vm1, %v329_v36, 0  ;;  %854 = vmatmul.msk.bf16.vlgmr.msra.gmra.mxu2 %vm97_vm1, %v89_v19 }
 0x113   :  { %343 = vmatpush.bf16.xpose.msra.mxu0 %v334_v38  ;;  %366 = vmatpush.bf16.xpose.msra.mxu1 %v357_v37 }
 0x119   :  { %v441_v40 = vpop.permute.xlu1 %440  ;;  %v350_v43 = vpop.permute.xlu0 %349 }
 0x11a   :  { %v446_v42 = vsel %vm97_vm1, %v441_v40, 0  ;;  %858 = vmatmul.msk.bf16.vlgmr.msrb.gmra.mxu1 %vm97_vm1, %v238_v29  ;;  %861 = vmatmul.msk.bf16.vlgmr.msra.gmra.mxu0 %vm97_vm1, %v327_v34 }
 0x11b   :  { %478 = vmatpush.bf16.xpose.msrb.mxu1 %v469_v41  ;;  %455 = vmatpush.bf16.xpose.msrb.mxu0 %v446_v42 }
 0x121   :  { %v439_v44 = vpop.permute.xlu0 %438  ;;  %v462_v45 = vpop.permute.xlu1 %461 }
 0x12a   :  { %862 = vmatmul.msk.bf16.vlgmr.msra.gmra.mxu1 %vm97_vm1, %v350_v43  ;;  %865 = vmatmul.msk.bf16.vlgmr.msrb.gmra.mxu0 %vm97_vm1, %v439_v44 }
 0x13a   :  { %866 = vmatmul.msk.bf16.vlgmr.msrb.gmra.mxu1 %vm97_vm1, %v462_v45 }
 0x187   :  { %v113_v46 = vpop.f32.mrf.mxu1  ;;  %v230_v47 = vpop.f32.mrf.mxu0 }
 0x188   :  { %v260_v48 = vsel %vm97_vm1, %v230_v47, -inf  ;;  %v141_v49 = vsel %vm97_vm1, %v113_v46, -inf }
 0x189   :  { %261 = vmax.xlane.f32.xlu1 %v260_v48  ;;  %142 = vmax.xlane.f32.xlu2 %v141_v49 }
 0x18f   :  { %v115_v50 = vpop.f32.mrf.mxu1  ;;  %v232_v51 = vpop.f32.mrf.mxu0 }
 0x195   :  { %v137_v52 = vpop.f32.mrf.mxu2 }
 0x196   :  { %v144_v53 = vsel %vm97_vm1, %v137_v52, -inf }
 0x197   :  { %145 = vmax.xlane.f32.xlu0 %v144_v53  ;;  %v256_v54 = vpop.f32.mrf.mxu1  ;;  %v1132_v55 = vpop.f32.mrf.mxu0 }
 0x198   :  { %v263_v56 = vsel %vm97_vm1, %v256_v54, -inf  ;;  %v372_v6 = vsel %vm97_vm1, %v1132_v55, -inf }
 0x199   :  { %264 = vmax.xlane.f32.xlu2 %v263_v56 }
 0x19d   :  { %v139_v57 = vpop.f32.mrf.mxu2 }
 0x19f   :  { %v258_v58 = vpop.f32.mrf.mxu1  ;;  %v347_v59 = vpop.f32.mrf.mxu0 }
 0x1a2   :  { %187 = vrot.lane.b32.xlu1 %v1105_v21, %s1001_s22 }
 0x1a7   :  { %v1136_v60 = vpop.f32.mrf.mxu1  ;;  %v1138_v61 = vpop.f32.mrf.mxu0 }
 0x1a8   :  { %v375_v5 = vsel %vm97_vm1, %v1136_v60, -inf  ;;  %v484_v7 = vsel %vm97_vm1, %v1138_v61, -inf }
 0x1aa   :  { %305 = vrot.lane.b32.xlu1 %v1105_v21, %s1002_s23 }
 0x1ab   :  { %284 = vrot.lane.b32.xlu0 %v1101_v12, %s1002_s23 }
 0x1af   :  { %v370_v62 = vpop.f32.mrf.mxu1  ;;  %v459_v63 = vpop.f32.mrf.mxu0 }
 0x1b1   :  { %165 = vrot.lane.b32.xlu2 %v1101_v12, %s1001_s22 }
 0x1b7   :  { %v480_v0 = vpop.f32.mrf.mxu1 }
 0x1b8   :  { %v487_v4 = vsel %vm97_vm1, %v480_v0, -inf }
 0x1bf   :  { %v482_v1 = vpop.f32.mrf.mxu1 }
 0x1d4   :  { %488 = vmax.xlane.f32.xlu1 %v487_v4 }
 0x1d5   :  { %376 = vmax.xlane.f32.xlu0 %v375_v5 }
 0x1da   :  { %373 = vmax.xlane.f32.xlu2 %v372_v6 }
 0x1dd   :  { %485 = vmax.xlane.f32.xlu0 %v484_v7 }
 0x1fc   :  { %v262_v8 = vpop.xlane.xlu1 %261  ;;  %v143_v9 = vpop.xlane.xlu2 %142 }
 0x1fd   :  { %v266_v10 = vsub.f32 %v230_v47, %v262_v8  ;;  %v147_v11 = vsub.f32 %v113_v46, %v143_v9 }
 0x1ff   :  { %v268_v13 = vmul.f32 1.442695, %v266_v10  ;;  %v149_v14 = vmul.f32 1.442695, %v147_v11 }
 0x201   :  { %952 = vpow2.f32 %v268_v13 }
 0x202   :  { %954 = vpow2.f32 %v149_v14 }
 0x207   :  { %v1150_v15 = vpop.eup %952 }
 0x208   :  { %v1152_v16 = vpop.eup %954  ;;  %v272_v17 = vsel %vm97_vm1, %v1150_v15, 0.0 }
 0x209   :  { %273 = vadd.xlane.f32.xlu0 %v272_v17  ;;  %v153_v18 = vsel %vm97_vm1, %v1152_v16, 0.0 }
 0x20a   :  { %154 = vadd.xlane.f32.xlu1 %v153_v18  ;;  %v146_v19 = vpop.xlane.xlu0 %145 }
 0x20b   :  { %v148_v20 = vsub.f32 %v137_v52, %v146_v19 }
 0x20c   :  { %v265_v22 = vpop.xlane.xlu2 %264 }
 0x20d   :  { %v151_v23 = vmul.f32 1.442695, %v148_v20  ;;  %v267_v24 = vsub.f32 %v256_v54, %v265_v22 }
 0x20f   :  { %956 = vpow2.f32 %v151_v23  ;;  %v270_v25 = vmul.f32 1.442695, %v267_v24 }
 0x211   :  { %958 = vpow2.f32 %v270_v25 }
 0x214   :  { %v188_v26 = vpop.permute.xlu1 %187  ;;  %v166_v27 = vpop.permute.xlu2 %165 }
 0x215   :  { %v1158_v28 = vpop.eup %956  ;;  %v172_v29 = vsel %vm170_vm2, %v166_v27, 0  ;;  %v193_v30 = vsel %vm170_vm2, %v188_v26, 0 }
 0x216   :  { %181 = vmatpush.bf16.msra.mxu3 %v172_v29  ;;  %v156_v31 = vsel %vm97_vm1, %v1158_v28, 0.0 }
 0x217   :  { %v1164_v32 = vpop.eup %958  ;;  %157 = vadd.xlane.f32.xlu0 %v156_v31 }
 0x218   :  { %v275_v33 = vsel %vm97_vm1, %v1164_v32, 0.0 }
 0x219   :  { %276 = vadd.xlane.f32.xlu2 %v275_v33 }
 0x21a   :  { %202 = vmatpush.bf16.msrb.mxu3 %v193_v30 }
 0x21c   :  { %v306_v36 = vpop.permute.xlu1 %305 }
 0x21d   :  { %v285_v34 = vpop.permute.xlu0 %284  ;;  %v311_v1 = vsel %vm170_vm2, %v306_v36, 0 }
 0x21e   :  { %v290_v35 = vsel %vm170_vm2, %v285_v34, 0 }
 0x21f   :  { %299 = vmatpush.bf16.msrb.mxu2 %v290_v35 }
 0x223   :  { %417 = vrot.lane.b32.xlu1 %v1105_v21, %s1003_s24 }
 0x231   :  { %396 = vrot.lane.b32.xlu2 %v1101_v12, %s1003_s24 }
 0x247   :  { %v489_v37 = vpop.xlane.xlu1 %488 }
 0x248   :  { %v491_v38 = vsub.f32 %v480_v0, %v489_v37  ;;  %v377_v39 = vpop.xlane.xlu0 %376 }
 0x249   :  { %v379_v40 = vsub.f32 %v1136_v60, %v377_v39 }
 0x24a   :  { %v494_v42 = vmul.f32 1.442695, %v491_v38 }
 0x24b   :  { %v382_v41 = vmul.f32 1.442695, %v379_v40 }
 0x24d   :  { %960 = vpow2.f32 %v382_v41  ;;  %v374_v43 = vpop.xlane.xlu2 %373 }
 0x24e   :  { %v378_v44 = vsub.f32 %v1132_v55, %v374_v43  ;;  %962 = vpow2.f32 %v494_v42 }
 0x250   :  { %v380_v45 = vmul.f32 1.442695, %v378_v44  ;;  %v486_v46 = vpop.xlane.xlu0 %485 }
 0x251   :  { %v490_v47 = vsub.f32 %v1138_v61, %v486_v46 }
 0x252   :  { %964 = vpow2.f32 %v380_v45 }
 0x253   :  { %v961_v48 = vpop.eup %960  ;;  %v492_v49 = vmul.f32 1.442695, %v490_v47 }
 0x254   :  { %v387_v50 = vsel %vm97_vm1, %v961_v48, 0.0  ;;  %v1175_v51 = vpop.eup %962 }
 0x255   :  { %966 = vpow2.f32 %v492_v49  ;;  %388 = vadd.xlane.f32.xlu0 %v387_v50  ;;  %v499_v54 = vsel %vm97_vm1, %v1175_v51, 0.0 }
 0x258   :  { %v965_v52 = vpop.eup %964 }
 0x259   :  { %v384_v53 = vsel %vm97_vm1, %v965_v52, 0.0 }
 0x25a   :  { %385 = vadd.xlane.f32.xlu1 %v384_v53  ;;  %500 = vadd.xlane.f32.xlu2 %v499_v54 }
 0x25b   :  { %v967_v55 = vpop.eup %966 }
 0x25c   :  { %v496_v56 = vsel %vm97_vm1, %v967_v55, 0.0 }
 0x25d   :  { %497 = vadd.xlane.f32.xlu0 %v496_v56  ;;  %v906_v56 = vld [vmem:[%s1282_s3] sm:$0xff] }
 0x271   :  { %508 = vrot.lane.b32.xlu0 %v1101_v12, %s1004_s25 }
 0x273   :  { %529 = vrot.lane.b32.xlu1 %v1105_v21, %s1004_s25 }
 0x27c   :  { %v274_v57 = vpop.xlane.xlu0 %273 }
 0x27d   :  { %968 = vrcp.f32 %v274_v57  ;;  %v155_v58 = vpop.xlane.xlu1 %154 }
 0x27e   :  { %970 = vrcp.f32 %v155_v58 }
 0x283   :  { %v969_v59 = vpop.eup %968 }
 0x284   :  { %v971_v60 = vpop.eup %970  ;;  %v280_v61 = vmul.f32 %v969_v59, %v1150_v15 }
 0x285   :  { %v161_v62 = vmul.f32 %v971_v60, %v1152_v16 }
 0x286   :  { %v282_v63 = vpack.c.bf16 %v280_v61, %v280_v61 }
 0x287   :  { %v163_v0 = vpack.c.bf16 %v161_v62, %v161_v62 }
 0x288   :  { %859 = vmatmul.msk.bf16.vlgmr.msrb.gmra.mxu2 %vm97_vm1, %v282_v63 }
 0x289   :  { %855 = vmatmul.msk.bf16.vlgmr.msra.gmra.mxu3 %vm97_vm1, %v163_v0 }
 0x28a   :  { %320 = vmatpush.bf16.msra.mxu3 %v311_v1  ;;  %v158_v12 = vpop.xlane.xlu0 %157 }
 0x28b   :  { %972 = vrcp.f32 %v158_v12 }
 0x28c   :  { %v277_v21 = vpop.xlane.xlu2 %276 }
 0x28d   :  { %974 = vrcp.f32 %v277_v21 }
 0x291   :  { %v973_v4 = vpop.eup %972 }
 0x292   :  { %v162_v5 = vmul.f32 %v973_v4, %v1158_v28 }
 0x293   :  { %v975_v11 = vpop.eup %974 }
 0x294   :  { %v397_v6 = vpop.permute.xlu2 %396  ;;  %v164_v9 = vpack.c.bf16 %v162_v5, %v162_v5  ;;  %v281_v13 = vmul.f32 %v975_v11, %v1164_v32 }
 0x295   :  { %v402_v7 = vsel %vm170_vm2, %v397_v6, 0  ;;  %v418_v8 = vpop.permute.xlu1 %417 }
 0x296   :  { %411 = vmatpush.bf16.msra.mxu2 %v402_v7  ;;  %v423_v10 = vsel %vm170_vm2, %v418_v8, 0  ;;  %v283_v14 = vpack.c.bf16 %v281_v13, %v281_v13 }
 0x299   :  { %856 = vmatmul.msk.bf16.vlgmr.msrb.gmra.mxu3 %vm97_vm1, %v164_v9  ;;  %v945_v9 = vld [vmem:[%s1281_s4] ss:$0 sm:$0xff] }
 0x29a   :  { %432 = vmatpush.bf16.msrb.mxu3 %v423_v10 }
 0x2a9   :  { %860 = vmatmul.msk.bf16.vlgmr.msra.gmra.mxu3 %vm97_vm1, %v283_v14 }
 0x2c8   :  { %v389_v15 = vpop.xlane.xlu0 %388 }
 0x2c9   :  { %976 = vrcp.f32 %v389_v15 }
 0x2cd   :  { %v386_v16 = vpop.xlane.xlu1 %385  ;;  %v501_v23 = vpop.xlane.xlu2 %500 }
 0x2ce   :  { %978 = vrcp.f32 %v386_v16 }
 0x2cf   :  { %v977_v17 = vpop.eup %976  ;;  %980 = vrcp.f32 %v501_v23 }
 0x2d0   :  { %v393_v18 = vmul.f32 %v977_v17, %v961_v48  ;;  %v498_v25 = vpop.xlane.xlu0 %497 }
 0x2d1   :  { %982 = vrcp.f32 %v498_v25 }
 0x2d2   :  { %v395_v19 = vpack.c.bf16 %v393_v18, %v393_v18 }
 0x2d4   :  { %864 = vmatmul.msk.bf16.vlgmr.msrb.gmra.mxu3 %vm97_vm1, %v395_v19  ;;  %v979_v20 = vpop.eup %978  ;;  %v1008_v19 = vmov 32.0  }
 0x2d5   :  { %v392_v22 = vmul.f32 %v979_v20, %v965_v52  ;;  %v981_v26 = vpop.eup %980  ;;  %984 = vrcp.f32 %v1008_v19 }
 0x2d6   :  { %v505_v29 = vmul.f32 %v981_v26, %v1175_v51 }
 0x2d7   :  { %v394_v24 = vpack.c.bf16 %v392_v22, %v392_v22  ;;  %v983_v27 = vpop.eup %982 }
 0x2d8   :  { %v504_v30 = vmul.f32 %v983_v27, %v967_v55  ;;  %v507_v34 = vpack.c.bf16 %v505_v29, %v505_v29  ;;  %v907_v55 = vld [vmem:[%s1282_s3 + $0x8] sm:$0xff] }
 0x2d9   :  { %863 = vmatmul.msk.bf16.vlgmr.msra.gmra.mxu2 %vm97_vm1, %v394_v24  ;;  %612 = vmatpush.bf16.msra.mxu0 %v907_v55  ;;  %v946_v55 = vld [vmem:[%s1283_s5] ss:$0 sm:$0xff] }
 0x2da   :  { %v506_v35 = vpack.c.bf16 %v504_v30, %v504_v30 }
 0x2db   :  { %v985_v20 = vpop.eup %984 }
 0x2dc   :  { %v629_v22 = vmul.f32 32.0, %v985_v20  ;;  %vm633_vm5 = vweird.f32 %v985_v20 }
 0x2dd   :  { %613 = vmatpush.bf16.msra.mxu0 %v906_v56 }
 0x2de   :  { %v630_v23 = vsub.f32 1.0, %v629_v22 }
 0x2e0   :  { %v631_v24 = vmul.f32 %v985_v20, %v630_v23 }
 0x2e2   :  { %v632_v25 = vadd.f32 %v985_v20, %v631_v24 }
 0x2e3   :  { %v509_v28 = vpop.permute.xlu0 %508 }
 0x2e4   :  { %v514_v31 = vsel %vm170_vm2, %v509_v28, 0  ;;  %v1217_v26 = vsel %vm633_vm5, %v985_v20, %v632_v25 }
 0x2e5   :  { %523 = vmatpush.bf16.msrb.mxu2 %v514_v31  ;;  %v530_v32 = vpop.permute.xlu1 %529 }
 0x2e6   :  { %v535_v33 = vsel %vm170_vm2, %v530_v32, 0 }
 0x2e7   :  { %544 = vmatpush.bf16.msra.mxu3 %v535_v33 }
 0x2e9   :  { %867 = vmatmul.msk.bf16.vlgmr.msrb.gmra.mxu2 %vm97_vm1, %v506_v35 }
 0x2ea   :  { %868 = vmatmul.msk.bf16.vlgmr.msra.gmra.mxu3 %vm97_vm1, %v507_v34 }
 0x30b   :  { %v301_v36 = vpop.f32.mrf.mxu2 }
 0x30c   :  { %v183_v37 = vpop.f32.mrf.mxu3 }
 0x313   :  { %v303_v38 = vpop.f32.mrf.mxu2 }
 0x314   :  { %v185_v39 = vpop.f32.mrf.mxu3 }
 0x315   :  { %v908_v39 = vld [vmem:[%s1286_s7] sm:$0xff] }
 0x31c   :  { %v204_v40 = vpop.f32.mrf.mxu3 }
 0x324   :  { %v206_v41 = vpop.f32.mrf.mxu3 }
 0x32c   :  { %v322_v42 = vpop.f32.mrf.mxu3 }
 0x32d   :  { %v929_v43 = vpack.i.bf16 %v322_v42, %v301_v36  ;;  %v909_v36 = vld [vmem:[%s1286_s7 + $0x8] sm:$0xff] }
 0x32e   :  { %715 = vmatpush.bf16.msra.mxu1 %v909_v36 }
 0x32f   :  { %930 = vrot.lane.b32.xlu0 %v929_v43, %s1005_s26 }
 0x332   :  { %716 = vmatpush.bf16.msra.mxu1 %v908_v39 }
 0x334   :  { %v324_v44 = vpop.f32.mrf.mxu3 }
 0x357   :  { %v434_v45 = vpop.f32.mrf.mxu3 }
 0x35c   :  { %v413_v46 = vpop.f32.mrf.mxu2 }
 0x35d   :  { %v934_v47 = vpack.i.bf16 %v434_v45, %v413_v46 }
 0x35f   :  { %v436_v48 = vpop.f32.mrf.mxu3  ;;  %935 = vrot.lane.b32.xlu1 %v934_v47, %s1006_s27 }
 0x364   :  { %v415_v49 = vpop.f32.mrf.mxu2 }
 0x36c   :  { %v525_v50 = vpop.f32.mrf.mxu2 }
 0x36d   :  { %v546_v51 = vpop.f32.mrf.mxu3 }
 0x36e   :  { %v939_v52 = vpack.i.bf16 %v546_v51, %v525_v50 }
 0x370   :  { %940 = vrot.lane.b32.xlu0 %v939_v52, %s1007_s28 }
 0x374   :  { %v527_v53 = vpop.f32.mrf.mxu2 }
 0x375   :  { %v548_v54 = vpop.f32.mrf.mxu3 }
 0x3a1   :  { %v931_v57 = vpop.permute.xlu0 %930 }
 0x3a2   :  { %v933_v59 = vunpack.i.h.bf16 %v931_v57  ;;  %v932_v60 = vunpack.i.l.bf16 %v931_v57 }
 0x3a4   :  { %v575_v0 = vsel %vm97_vm1, %v204_v40, %v933_v59  ;;  %v574_v1 = vsel %vm97_vm1, %v183_v37, %v932_v60  ;;  %v947_v59 = vld [vmem:[%s1284_s6] ss:$0 sm:$0xff] }
 0x3d1   :  { %v936_v58 = vpop.permute.xlu1 %935 }
 0x3d2   :  { %v938_v61 = vunpack.i.h.bf16 %v936_v58  ;;  %v937_v62 = vunpack.i.l.bf16 %v936_v58 }
 0x3d4   :  { %v578_v4 = vsel %vm576_vm3, %v575_v0, %v938_v61  ;;  %v577_v5 = vsel %vm576_vm3, %v574_v1, %v937_v62 }
 0x3e2   :  { %v941_v63 = vpop.permute.xlu0 %940 }
 0x3e3   :  { %v943_v12 = vunpack.i.h.bf16 %v941_v63  ;;  %v942_v21 = vunpack.i.l.bf16 %v941_v63 }
 0x3e5   :  { %v580_v6 = vsel %vm579_vm4, %v577_v5, %v942_v21  ;;  %v581_v7 = vsel %vm579_vm4, %v578_v4, %v943_v12  ;;  %v913_v12 = vld [vmem:[%s1288_s9 + $0x18] sm:$0xff]  ;;  %v912_v21 = vld [vmem:[%s1288_s9 + $0x10] sm:$0xff]  ;;  %v911_v4 = vld [vmem:[%s1288_s9 + $0x8] sm:$0xff] }
 0x3e6   :  { %v582_v8 = vpack.c.bf16 %v581_v7, %v580_v6  ;;  %770 = vmatpush.bf16.msra.mxu2 %v913_v12  ;;  %v910_v5 = vld [vmem:[%s1288_s9] sm:$0xff] }
 0x3e7   :  { %v948_v7 = vld [vmem:[%s1285_s8] ss:$0 sm:$0xff] }
 0x3e8   :  { %877 = vmatmul.msk.bf16.vlgmr.msra.gmra.mxu0 %vm68_vm0, %v582_v8 }
 0x3ea   :  { %771 = vmatpush.bf16.msra.mxu2 %v912_v21 }
 0x3ee   :  { %772 = vmatpush.bf16.msra.mxu2 %v911_v4 }
 0x3f2   :  { %773 = vmatpush.bf16.msra.mxu2 %v910_v5 }
 0x465   :  { %v615_v10 = vpop.f32.mrf.mxu0 }
 0x466   :  { %v616_v11 = vadd.f32 %v945_v9, %v615_v10 }
 0x468   :  { %v620_v13 = vadd.f32 %v616_v11, %v1088_v2 }
 0x46a   :  { %v622_v14 = vsel %vm68_vm0, %v620_v13, 0.0 }
 0x46b   :  { %623 = vadd.xlane.f32.xlu1 %v622_v14 }
 0x46d   :  { %v617_v15 = vpop.f32.mrf.mxu0 }
 0x46e   :  { %v618_v16 = vadd.f32 %v945_v9, %v617_v15  ;;  %v949_v15 = vld [vmem:[%s1287_s10] ss:$0 sm:$0xff] }
 0x470   :  { %v621_v17 = vadd.f32 %v618_v16, %v1093_v3 }
 0x472   :  { %v625_v18 = vsel %vm68_vm0, %v621_v17, 0.0 }
 0x473   :  { %626 = vadd.xlane.f32.xlu2 %v625_v18 }
 0x4de   :  { %v624_v2 = vpop.xlane.xlu1 %623 }
 0x4df   :  { %v635_v27 = vmul.f32 %v1217_v26, %v624_v2 }
 0x4e1   :  { %v637_v28 = vsub.f32 %v620_v13, %v635_v27 }
 0x4e3   :  { %v639_v29 = vmul.f32 %v637_v28, %v637_v28 }
 0x4e5   :  { %v641_v3 = vsel %vm68_vm0, %v639_v29, 0.0 }
 0x4e6   :  { %v627_v30 = vpop.xlane.xlu2 %626  ;;  %642 = vadd.xlane.f32.xlu0 %v641_v3 }
 0x4e7   :  { %v636_v31 = vmul.f32 %v1217_v26, %v627_v30 }
 0x4e9   :  { %v638_v32 = vsub.f32 %v621_v17, %v636_v31 }
 0x4eb   :  { %v640_v33 = vmul.f32 %v638_v32, %v638_v32 }
 0x4ed   :  { %v644_v34 = vsel %vm68_vm0, %v640_v33, 0.0 }
 0x4ee   :  { %645 = vadd.xlane.f32.xlu2 %v644_v34 }
 0x559   :  { %v643_v35 = vpop.xlane.xlu0 %642 }
 0x55a   :  { %v647_v37 = vmul.f32 %v643_v35, %v1217_v26 }
 0x55c   :  { %v649_v38 = vadd.f32 1e-05, %v647_v37 }
 0x55e   :  { %986 = vrsqrt.f32 %v649_v38  ;;  %vm657_vm7 = vweird.f32 %v649_v38 }
 0x561   :  { %v646_v40 = vpop.xlane.xlu2 %645 }
 0x562   :  { %v648_v41 = vmul.f32 %v646_v40, %v1217_v26 }
 0x564   :  { %v987_v42 = vpop.eup %986  ;;  %v650_v43 = vadd.f32 1e-05, %v648_v41 }
 0x565   :  { %v652_v44 = vmul.f32 %v987_v42, %v649_v38  ;;  %vm658_vm6 = vweird.f32 %v987_v42 }
 0x566   :  { %988 = vrsqrt.f32 %v650_v43  ;;  %vm659_vm8 = vmor %vm657_vm7, %vm658_vm6  ;;  %vm667_vm10 = vweird.f32 %v650_v43 }
 0x567   :  { %v653_v45 = vmul.f32 %v987_v42, %v652_v44 }
 0x569   :  { %v654_v46 = vmul.f32 0.5, %v653_v45 }
 0x56b   :  { %v655_v47 = vsub.f32 1.5, %v654_v46 }
 0x56c   :  { %v989_v48 = vpop.eup %988 }
 0x56d   :  { %v656_v49 = vmul.f32 %v987_v42, %v655_v47  ;;  %v662_v50 = vmul.f32 %v989_v48, %v650_v43  ;;  %vm668_vm9 = vweird.f32 %v989_v48 }
 0x56e   :  { %vm669_vm11 = vmor %vm667_vm10, %vm668_vm9 }
 0x56f   :  { %v663_v51 = vmul.f32 %v989_v48, %v662_v50  ;;  %v660_v52 = vsel %vm659_vm8, %v987_v42, %v656_v49 }
 0x570   :  { %v671_v56 = vmul.f32 %v660_v52, %v637_v28 }
 0x571   :  { %v664_v53 = vmul.f32 0.5, %v663_v51 }
 0x572   :  { %v677_v60 = vmul.f32 %v946_v55, %v671_v56 }
 0x573   :  { %v665_v54 = vsub.f32 1.5, %v664_v53 }
 0x574   :  { %v683_v63 = vadd.f32 %v947_v59, %v677_v60 }
 0x575   :  { %v666_v57 = vmul.f32 %v989_v48, %v665_v54 }
 0x577   :  { %v670_v58 = vsel %vm669_vm11, %v989_v48, %v666_v57  ;;  %v950_v48 = vld [vmem:[%s1289_s11] ss:$0 sm:$0xff] }
 0x578   :  { %v672_v61 = vmul.f32 %v670_v58, %v638_v32 }
 0x57a   :  { %v678_v62 = vmul.f32 %v946_v55, %v672_v61 }
 0x57c   :  { %v684_v0 = vadd.f32 %v947_v59, %v678_v62 }
 0x57e   :  { %v685_v1 = vpack.c.bf16 %v684_v0, %v683_v63 }
 0x580   :  { %886 = vmatmul.msk.bf16.vlgmr.msra.gmra.mxu1 %vm68_vm0, %v685_v1 }
 0x5fd   :  { %v718_v6 = vpop.f32.mrf.mxu1 }
 0x5fe   :  { %v719_v8 = vadd.f32 %v948_v7, %v718_v6 }
 0x600   :  { %v723_v11 = vmax.f32 %v719_v8, 0.0 }
 0x605   :  { %v720_v9 = vpop.f32.mrf.mxu1 }
 0x606   :  { %v721_v10 = vadd.f32 %v948_v7, %v720_v9 }
 0x608   :  { %v724_v13 = vmax.f32 %v721_v10, 0.0 }
 0x60a   :  { %v725_v14 = vpack.c.bf16 %v724_v13, %v723_v11 }
 0x60c   :  { %903 = vmatmul.msk.bf16.vlgmr.msra.gmra.mxu2 %vm762_vm12, %v725_v14 }
 0x68f   :  { %v775_v16 = vpop.f32.mrf.mxu2 }
 0x690   :  { %v776_v17 = vadd.f32 %v949_v15, %v775_v16 }
 0x692   :  { %v780_v18 = vadd.f32 %v776_v17, %v683_v63 }
 0x694   :  { %v782_v19 = vsel %vm68_vm0, %v780_v18, 0.0 }
 0x695   :  { %783 = vadd.xlane.f32.xlu2 %v782_v19 }
 0x697   :  { %v777_v20 = vpop.f32.mrf.mxu2 }
 0x698   :  { %v778_v22 = vadd.f32 %v949_v15, %v777_v20 }
 0x69a   :  { %v781_v23 = vadd.f32 %v778_v22, %v684_v0 }
 0x69c   :  { %v785_v24 = vsel %vm68_vm0, %v781_v23, 0.0 }
 0x69d   :  { %786 = vadd.xlane.f32.xlu2 %v785_v24 }
 0x708   :  { %v784_v25 = vpop.xlane.xlu2 %783 }
 0x709   :  { %v788_v2 = vmul.f32 %v784_v25, %v1217_v26 }
 0x70b   :  { %v790_v27 = vsub.f32 %v780_v18, %v788_v2 }
 0x70d   :  { %v792_v28 = vmul.f32 %v790_v27, %v790_v27 }
 0x70f   :  { %v794_v29 = vsel %vm68_vm0, %v792_v28, 0.0 }
 0x710   :  { %795 = vadd.xlane.f32.xlu2 %v794_v29  ;;  %v787_v3 = vpop.xlane.xlu2 %786 }
 0x711   :  { %v789_v30 = vmul.f32 %v787_v3, %v1217_v26 }
 0x713   :  { %v791_v31 = vsub.f32 %v781_v23, %v789_v30 }
 0x715   :  { %v793_v32 = vmul.f32 %v791_v31, %v791_v31 }
 0x717   :  { %v797_v33 = vsel %vm68_vm0, %v793_v32, 0.0 }
 0x718   :  { %798 = vadd.xlane.f32.xlu1 %v797_v33 }
 0x783   :  { %v796_v34 = vpop.xlane.xlu2 %795 }
 0x784   :  { %v800_v35 = vmul.f32 %v796_v34, %v1217_v26 }
 0x786   :  { %v802_v36 = vadd.f32 1e-05, %v800_v35 }
 0x788   :  { %990 = vrsqrt.f32 %v802_v36  ;;  %vm810_vm14 = vweird.f32 %v802_v36 }
 0x78b   :  { %v799_v37 = vpop.xlane.xlu1 %798 }
 0x78c   :  { %v801_v38 = vmul.f32 %v799_v37, %v1217_v26  ;;  %v951_v26 = vld [vmem:[%s1290_s12] ss:$0 sm:$0xff] }
 0x78e   :  { %v991_v39 = vpop.eup %990  ;;  %v803_v40 = vadd.f32 1e-05, %v801_v38 }
 0x78f   :  { %v805_v41 = vmul.f32 %v991_v39, %v802_v36  ;;  %vm811_vm13 = vweird.f32 %v991_v39 }
 0x790   :  { %992 = vrsqrt.f32 %v803_v40  ;;  %vm812_vm15 = vmor %vm810_vm14, %vm811_vm13  ;;  %vm820_vm2 = vweird.f32 %v803_v40 }
 0x791   :  { %v806_v42 = vmul.f32 %v991_v39, %v805_v41 }
 0x793   :  { %v807_v43 = vmul.f32 0.5, %v806_v42 }
 0x795   :  { %v808_v44 = vsub.f32 1.5, %v807_v43 }
 0x796   :  { %v993_v45 = vpop.eup %992 }
 0x797   :  { %v809_v46 = vmul.f32 %v991_v39, %v808_v44  ;;  %v815_v47 = vmul.f32 %v993_v45, %v803_v40  ;;  %vm821_vm1 = vweird.f32 %v993_v45 }
 0x798   :  { %vm822_vm3 = vmor %vm820_vm2, %vm821_vm1 }
 0x799   :  { %v813_v49 = vsel %vm812_vm15, %v991_v39, %v809_v46  ;;  %v816_v50 = vmul.f32 %v993_v45, %v815_v47 }
 0x79a   :  { %v824_v51 = vmul.f32 %v813_v49, %v790_v27 }
 0x79b   :  { %v817_v52 = vmul.f32 0.5, %v816_v50 }
 0x79c   :  { %v830_v53 = vmul.f32 %v950_v48, %v824_v51 }
 0x79d   :  { %v818_v54 = vsub.f32 1.5, %v817_v52 }
 0x79e   :  { %v836_v55 = vadd.f32 %v951_v26, %v830_v53 }
 0x79f   :  { %v819_v56 = vmul.f32 %v993_v45, %v818_v54 }
 0x7a0   :  { %838 = vst.msk [vmem:[%s1291_s13] sm:$0xff] %vm68_vm0, %v836_v55 }
 0x7a1   :  { %v823_v57 = vsel %vm822_vm3, %v993_v45, %v819_v56 }
 0x7a2   :  { %v825_v58 = vmul.f32 %v823_v57, %v791_v31 }
 0x7a4   :  { %v831_v59 = vmul.f32 %v950_v48, %v825_v58 }
 0x7a6   :  { %v837_v60 = vadd.f32 %v951_v26, %v831_v59 }
 0x7a8   :  { %839 = vst.msk [vmem:[%s1291_s13 + $0x8] sm:$0xff] %vm68_vm0, %v837_v60 }

</bundles_post_ra>
